<compile_context>
chip_gen: v6e
topology: v6e:2x2x1
jax: 0.10.0
libtpu: 0.0.40
codegen_flags: <defaults>
</compile_context>

<pallas_src>
import jax
import jax.numpy as jnp
from jax.experimental import pallas as pl
from jax.experimental.pallas import tpu as pltpu


# ----------------------------- Pallas kernel ------------------------------ #
def _gemm_bias_kernel(x_ref, w_ref, b_ref, o_ref, acc_ref):
    # x_ref:  (tm, tk)  bf16 im2col tile
    # w_ref:  (tk, tn)  bf16 weight tile
    # b_ref:  (1,  tn)  f32 bias tile (broadcast over rows)
    # o_ref:  (tm, tn)  f32 output tile
    # acc_ref:(tm, tn)  f32 accumulator scratch (resident across K steps)
    k = pl.program_id(2)

    @pl.when(k == 0)
    def _():
        acc_ref[...] = jnp.zeros_like(acc_ref)

    acc_ref[...] += jnp.dot(
        x_ref[...], w_ref[...], preferred_element_type=jnp.float32
    )

    @pl.when(k == pl.num_programs(2) - 1)
    def _():
        o_ref[...] = (acc_ref[...] + b_ref[...]).astype(o_ref.dtype)


def _round_up(a, b):
    return (a + b - 1) // b * b


def _pallas_gemm_bias(patches, w_mat, bias, *, tm=512, tn=512, tk=512):
    """patches: (M, K) bf16, w_mat: (K, N) bf16, bias: (N,) f32 -> (M, N) f32."""
    M, K = patches.shape
    K2, N = w_mat.shape
    assert K2 == K

    # Effective tile sizes: K/N tiles lane-dense (multiples of 128), M tile a
    # multiple of 8 (sublane).  Clamp to padded problem size for small layers.
    tm = min(tm, _round_up(M, 8))
    tk = min(tk, _round_up(K, 128))
    tn = min(tn, _round_up(N, 128))

    Mp = _round_up(M, tm)
    Kp = _round_up(K, tk)
    Np = _round_up(N, tn)

    x_p = patches if (Mp, Kp) == (M, K) else jnp.pad(
        patches, ((0, Mp - M), (0, Kp - K)))
    w_p = w_mat if (Kp, Np) == (K, N) else jnp.pad(
        w_mat, ((0, Kp - K), (0, Np - N)))
    b_p = bias.reshape(1, N)
    if Np != N:
        b_p = jnp.pad(b_p, ((0, 0), (0, Np - N)))

    grid = (Mp // tm, Np // tn, Kp // tk)

    # Advisory cost hint so XLA schedules the surrounding layout ops sensibly.
    cost = pl.CostEstimate(
        flops=2 * Mp * Kp * Np,
        transcendentals=0,
        bytes_accessed=Mp * Kp * 2 + Kp * Np * 2 + Np * 4 + Mp * Np * 4,
    )

    # VMEM budget: double-buffered bf16 x/w tiles + bias + f32 out + f32 acc.
    vmem_need = (2 * tm * tk * 2 + 2 * tk * tn * 2 + 2 * tn * 4
                 + 2 * tm * tn * 4 + tm * tn * 4)
    vmem_limit = int(min(max(2 * vmem_need, 32 << 20), 64 << 20))

    out = pl.pallas_call(
        _gemm_bias_kernel,
        out_shape=jax.ShapeDtypeStruct((Mp, Np), jnp.float32),
        grid_spec=pltpu.PrefetchScalarGridSpec(
            num_scalar_prefetch=0,
            grid=grid,
            in_specs=[
                pl.BlockSpec((tm, tk), lambda i, j, k: (i, k)),
                pl.BlockSpec((tk, tn), lambda i, j, k: (k, j)),
                pl.BlockSpec((1, tn), lambda i, j, k: (0, j)),
            ],
            out_specs=pl.BlockSpec((tm, tn), lambda i, j, k: (i, j)),
            scratch_shapes=[pltpu.VMEM((tm, tn), jnp.float32)],
        ),
        compiler_params=pltpu.CompilerParams(
            dimension_semantics=("parallel", "parallel", "arbitrary"),
            vmem_limit_bytes=vmem_limit,
        ),
        cost_estimate=cost,
    )(x_p, w_p, b_p)

    if (Mp, Np) != (M, N):
        out = out[:M, :N]
    return out


# ------------------------- aten.convolution wrapper ------------------------ #
def aten_convolution(x, weight, bias, stride, padding, dilation,
                     transposed=False, output_padding=(0, 0), groups=1):
    """Mirrors torch.ops.aten.convolution.default for the 2D, non-transposed,
    groups=1 case used by inception_v4."""
    assert not transposed, "transposed convolution not supported"
    # TODO(synk): grouped / transposed convolution variants not implemented.
    assert groups == 1, "groups != 1 not supported"

    N, C, H, W = x.shape
    OC, IC, KH, KW = weight.shape
    assert IC == C
    sh, sw = stride
    ph, pw = padding
    dh, dw = dilation

    OH = (H + 2 * ph - dh * (KH - 1) - 1) // sh + 1
    OW = (W + 2 * pw - dw * (KW - 1) - 1) // sw + 1

    # NCHW -> NHWC, cast to bf16 up front (im2col tensor is KH*KW x activation
    # size; bf16 halves that HBM traffic), zero-pad spatially.
    x_nhwc = jnp.transpose(x, (0, 2, 3, 1)).astype(jnp.bfloat16)
    x_pad = jnp.pad(x_nhwc, ((0, 0), (ph, ph), (pw, pw), (0, 0)))

    # im2col: rows ordered (n, oh, ow); cols ordered (kh, kw, c).
    # TODO(synk): fold the kh/kw window gather into the kernel grid (strided
    # index_maps) to avoid materializing the im2col tensor in HBM entirely.
    patch_list = []
    for kh in range(KH):
        for kw in range(KW):
            h0 = kh * dh
            w0 = kw * dw
            sl = x_pad[:, h0:h0 + (OH - 1) * sh + 1:sh,
                          w0:w0 + (OW - 1) * sw + 1:sw, :]
            patch_list.append(sl)
    patches = jnp.concatenate(patch_list, axis=-1)           # (N, OH, OW, KH*KW*C)
    patches = patches.reshape(N * OH * OW, KH * KW * C)      # bf16

    # weight OIHW -> (KH, KW, C, OC) -> (KH*KW*C, OC)  (matches patch col order)
    w_mat = jnp.transpose(weight.astype(jnp.bfloat16), (2, 3, 1, 0))
    w_mat = w_mat.reshape(KH * KW * C, OC)

    b_vec = (jnp.zeros((OC,), jnp.float32) if bias is None
             else bias.astype(jnp.float32))

    out = _pallas_gemm_bias(patches, w_mat, b_vec)            # (N*OH*OW, OC) f32
    out = out.reshape(N, OH, OW, OC)
    return jnp.transpose(out, (0, 3, 1, 2))                   # back to NCHW


# --------------------------------- main ------------------------------------ #
if __name__ == "__main__":
    key = jax.random.PRNGKey(0)
    k_x, k_w, k_b = jax.random.split(key, 3)

    # Small, inception-like conv: 3x3, stride 2, "VALID"-ish padding 0.
    N, C, H, W = 2, 4, 16, 16
    OC, KH, KW = 8, 3, 3
    stride, padding, dilation = (2, 2), (0, 0), (1, 1)

    x = jax.random.normal(k_x, (N, C, H, W), jnp.float32)
    w = jax.random.normal(k_w, (OC, C, KH, KW), jnp.float32) * 0.1
    b = jax.random.normal(k_b, (OC,), jnp.float32) * 0.1

    out = aten_convolution(x, w, b, stride, padding, dilation,
                           transposed=False, output_padding=(0, 0), groups=1)
    out = jax.block_until_ready(out)

    # Reference check against XLA's convolution (f32).  Kernel uses bf16
    # operands with f32 accumulation, so compare at bf16-level tolerance.
    ref = jax.lax.conv_general_dilated(
        x, w, window_strides=stride, padding=[(0, 0), (0, 0)],
        rhs_dilation=dilation,
        dimension_numbers=("NCHW", "OIHW", "NCHW"))
    ref = ref + b.reshape(1, OC, 1, 1)

    assert out.shape == ref.shape, (out.shape, ref.shape)
    max_err = float(jnp.max(jnp.abs(out - ref)))
    assert jnp.allclose(out, ref, atol=2e-2, rtol=2e-2), max_err

    print("KERNEL_OK")
</pallas_src>

<mosaic_0001>
module attributes {stable_mosaic.version = 11 : i64} {
  func.func @_gemm_bias_kernel(%arg0: i32, %arg1: i32, %arg2: i32, %arg3: memref<104x128xbf16, #tpu.memory_space<vmem>>, %arg4: memref<128x128xbf16, #tpu.memory_space<vmem>>, %arg5: memref<1x128xf32, #tpu.memory_space<vmem>>, %arg6: memref<104x128xf32, #tpu.memory_space<vmem>>, %arg7: memref<104x128xf32, #tpu.memory_space<vmem>>) attributes {dimension_semantics = [#tpu.dimension_semantics<parallel>, #tpu.dimension_semantics<parallel>, #tpu.dimension_semantics<arbitrary>], iteration_bounds = array<i64: 1, 1, 1>, scalar_prefetch = 0 : i64, scratch_operands = 1 : i64, tpu.core_type = #tpu.core_type<tc>, window_params = [{transform_indices = @transform_0, window_bounds = array<i64: 104, 128>}, {transform_indices = @transform_1, window_bounds = array<i64: 128, 128>}, {transform_indices = @transform_2, window_bounds = array<i64: 1, 128>}, {transform_indices = @transform_3, window_bounds = array<i64: 104, 128>}]} {
    %c0_i32 = arith.constant 0 : i32
    %0 = arith.cmpi eq, %arg2, %c0_i32 : i32
    %1 = arith.extui %0 : i1 to i32
    %c0_i32_0 = arith.constant 0 : i32
    %2 = arith.cmpi ne, %1, %c0_i32_0 : i32
    scf.if %2 {
      %cst_10 = arith.constant 0.000000e+00 : f32
      %12 = vector.broadcast %cst_10 : f32 to vector<104x128xf32>
      %c0_11 = arith.constant 0 : index
      %c0_12 = arith.constant 0 : index
      %13 = vector.load %arg7[%c0_11, %c0_12] : memref<104x128xf32, #tpu.memory_space<vmem>>, vector<104x128xf32>
      tpu.vector_store %arg7[%c0_11, %c0_12], %12 {strides = array<i32>} : memref<104x128xf32, #tpu.memory_space<vmem>>, vector<104x128xf32>,
    } else {
    }
    %c0 = arith.constant 0 : index
    %c0_1 = arith.constant 0 : index
    %3 = vector.load %arg7[%c0, %c0_1] : memref<104x128xf32, #tpu.memory_space<vmem>>, vector<104x128xf32>
    %c0_2 = arith.constant 0 : index
    %c0_3 = arith.constant 0 : index
    %4 = vector.load %arg3[%c0_2, %c0_3] : memref<104x128xbf16, #tpu.memory_space<vmem>>, vector<104x128xbf16>
    %c0_4 = arith.constant 0 : index
    %c0_5 = arith.constant 0 : index
    %5 = vector.load %arg4[%c0_4, %c0_5] : memref<128x128xbf16, #tpu.memory_space<vmem>>, vector<128x128xbf16>
    %cst = arith.constant dense<0.000000e+00> : vector<104x128xf32>
    %6 = tpu.matmul %4, %5, %cst {dimension_numbers = #tpu.dot_dimension_numbers<[1], [0], [0], [1], [0, 0, 1, 1], [], []>} : vector<104x128xbf16>, vector<128x128xbf16>, vector<104x128xf32> -> vector<104x128xf32>
    %7 = arith.addf %3, %6 : vector<104x128xf32>
    %c0_6 = arith.constant 0 : index
    %c0_7 = arith.constant 0 : index
    %8 = vector.load %arg7[%c0_6, %c0_7] : memref<104x128xf32, #tpu.memory_space<vmem>>, vector<104x128xf32>
    tpu.vector_store %arg7[%c0_6, %c0_7], %7 {strides = array<i32>} : memref<104x128xf32, #tpu.memory_space<vmem>>, vector<104x128xf32>,
    %c0_i32_8 = arith.constant 0 : i32
    %9 = arith.cmpi eq, %arg2, %c0_i32_8 : i32
    %10 = arith.extui %9 : i1 to i32
    %c0_i32_9 = arith.constant 0 : i32
    %11 = arith.cmpi ne, %10, %c0_i32_9 : i32
    scf.if %11 {
      %c0_10 = arith.constant 0 : index
      %c0_11 = arith.constant 0 : index
      %12 = vector.load %arg7[%c0_10, %c0_11] : memref<104x128xf32, #tpu.memory_space<vmem>>, vector<104x128xf32>
      %c0_12 = arith.constant 0 : index
      %c0_13 = arith.constant 0 : index
      %13 = vector.load %arg5[%c0_12, %c0_13] : memref<1x128xf32, #tpu.memory_space<vmem>>, vector<1x128xf32>
      %14 = vector.broadcast %13 : vector<1x128xf32> to vector<104x128xf32>
      %15 = arith.addf %12, %14 : vector<104x128xf32>
      %c0_14 = arith.constant 0 : index
      %c0_15 = arith.constant 0 : index
      %16 = vector.load %arg6[%c0_14, %c0_15] : memref<104x128xf32, #tpu.memory_space<vmem>>, vector<104x128xf32>
      tpu.vector_store %arg6[%c0_14, %c0_15], %15 {strides = array<i32>} : memref<104x128xf32, #tpu.memory_space<vmem>>, vector<104x128xf32>,
    } else {
    }
    return
  }
  func.func @transform_0(%arg0: i32, %arg1: i32, %arg2: i32) -> (i32, i32) {
    %c0_i32 = arith.constant 0 : i32
    return %arg0, %arg2 : i32, i32
  }
  func.func @transform_1(%arg0: i32, %arg1: i32, %arg2: i32) -> (i32, i32) {
    %c0_i32 = arith.constant 0 : i32
    return %arg2, %arg1 : i32, i32
  }
  func.func @transform_2(%arg0: i32, %arg1: i32, %arg2: i32) -> (i32, i32) {
    %c0_i32 = arith.constant 0 : i32
    %c0_i32_0 = arith.constant 0 : i32
    return %c0_i32, %arg1 : i32, i32
  }
  func.func @transform_3(%arg0: i32, %arg1: i32, %arg2: i32) -> (i32, i32) {
    %c0_i32 = arith.constant 0 : i32
    return %arg0, %arg1 : i32, i32
  }
}

</mosaic_0001>

<bundles_post_ra>
// kernel: tpu_custom_call.1
= control target key start
LH: loop header
LB: loop body
LE: loop exit
PB: predicated region body
PF: predicated region fallthrough
CT: control target
= control target key end

     0   :  { %8 = vsyncpa [#allocation4], 0  ;;  %s601_s0 = inlined_call_operand.hbm [shape: bf16[104,128], index: 0, kind: input, shape index: {}]   ;;  %s602_s1 = inlined_call_operand.hbm [shape: bf16[128,128], index: 1, kind: input, shape index: {}]   ;;  %s603_s2 = inlined_call_operand.vmem [shape: f32[1,128], index: 2, kind: input, shape index: {}]   ;;  %s604_s3 = inlined_call_operand.hbm [shape: f32[104,128], index: 3, kind: output, shape index: {}]  }
   0x1   :  { %9 = vsyncpa [#allocation7], 0 }
   0x2   :  { %10 = vsyncpa [#allocation5], 0  ;;  %s553_s12 = smov [#allocation3]  }
   0x3   :  { %s16_s13 = sshll.u32 %s553_s12, 4  ;;  %s17_s13 = int_to_ptr.vmem [resolvable:$true] %s16_s13 }
   0x4   :  { %s495_s14 = scalar_lea.vmem %s17_s13, 832  ;;  %p500_p1 = scmp.lt.s32.totalorder %s17_s13, %s17_s13 }
   0x5   :  { %p496_p0 = scmp.ne.s32.totalorder %s17_s13, %s495_s14  ;;  %p501_p2 = scmp.lt.s32.totalorder %s495_s14, %s495_s14 }
   0x7   :  { %p502_p3 = por %p501_p2, %p500_p1 }
   0x9   :  { %p503_p4 = pnand %p502_p3, %p496_p0 }
   0xb   :  { %506 = shalt.err (!%p503_p4)
}
   0xc   :  { %s554_s15 = smov 64   ;;  %s555_s16 = smov 4  }
   0xd   :  { %22 = dma.hbm_to_vmem [thread:$0]  %s601_s0, 832, %s17_s13, [#allocation4], %s554_s15, %s554_s15, %s555_s16  }
   0xe   :  { %s556_s19 = smov [#allocation6]  }
   0xf   :  { %s28_s20 = sshll.u32 %s556_s19, 4  ;;  %s29_s20 = int_to_ptr.vmem [resolvable:$true] %s28_s20 }
  0x10   :  { %s515_s21 = scalar_lea.vmem %s29_s20, 1024  ;;  %p520_p6 = scmp.lt.s32.totalorder %s29_s20, %s29_s20 }
  0x11   :  { %p516_p5 = scmp.ne.s32.totalorder %s29_s20, %s515_s21  ;;  %p521_p7 = scmp.lt.s32.totalorder %s515_s21, %s515_s21 }
  0x13   :  { %p522_p8 = por %p521_p7, %p520_p6 }
  0x15   :  { %p523_p9 = pnand %p522_p8, %p516_p5 }
  0x17   :  { %526 = shalt.err (!%p523_p9)
}
  0x18   :  { %34 = dma.hbm_to_vmem [thread:$0]  %s602_s1, 1024, %s29_s20, [#allocation7], %s554_s15, %s554_s15, %s555_s16  }
  0x19   :  { %547 = dma.done.wait [#allocation4], 832  }
  0x1a   :  { %548 = vsyncadd [#allocation4], 4294966464 }
  0x1b   :  { %549 = dma.done.wait [#allocation7], 1024  }
  0x1c   :  { %550 = vsyncadd [#allocation7], 4294966272  ;;  %v557_v0 = vmov 0.0   ;;  %vm558_vm0 = vmmov 0   ;;  %v472_v1 = vld [vmem:[#allocation6 + $0x38] sm:$0xff]   ;;  %v473_v2 = vld [vmem:[#allocation6 + $0x30] sm:$0xff]  }
  0x1d   :  { %403 = vmatprep.subr.bf16.mxu0 %v557_v0  ;;  %447 = vmatprep.subr.bf16.mxu1 %v557_v0  ;;  %v474_v3 = vld [vmem:[#allocation6 + $0x28] sm:$0xff]   ;;  %v475_v4 = vld [vmem:[#allocation6 + $0x20] sm:$0xff]   ;;  %v476_v5 = vld [vmem:[#allocation6 + $0x18] sm:$0xff]  }
  0x1e   :  { %419 = vmatprep.mubr.msk.bf16.mxu0 %vm558_vm0, %v557_v0  ;;  %435 = vmatprep.mubr.msk.bf16.mxu1 %vm558_vm0, %v557_v0  ;;  %v477_v6 = vld [vmem:[#allocation6 + $0x10] sm:$0xff]   ;;  %v478_v7 = vld [vmem:[#allocation6 + $0x8] sm:$0xff]   ;;  %v479_v8 = vld [vmem:[#allocation6] sm:$0xff]  }
  0x1f   :  { %404 = vmatpush3.bf16.msra.mxu0 %v472_v1  ;;  %455 = vmatpush3.bf16.msra.mxu1 %v472_v1  ;;  %v480_v9 = vld [vmem:[#allocation3] sm:$0xff]   ;;  %v482_v11 = vld [vmem:[#allocation3 + $0x8] sm:$0xff]   ;;  %v484_v13 = vld [vmem:[#allocation3 + $0x10] sm:$0xff]  }
  0x20   :  { %405 = vmatprep.subr.bf16.mxu0 %v557_v0  ;;  %448 = vmatprep.subr.bf16.mxu1 %v557_v0  ;;  %v481_v10 = vld [vmem:[#allocation3 + $0x20] sm:$0xff]   ;;  %v483_v12 = vld [vmem:[#allocation3 + $0x28] sm:$0xff]   ;;  %v485_v14 = vld [vmem:[#allocation3 + $0x30] ss:$0 sps:$4 sm:$0xff]  }
  0x21   :  { %v486_v15 = vld [vmem:[#allocation3 + $0x18] sm:$0xff]   ;;  %v387_v16 = vld [vmem:[%s603_s2] ss:$0 sm:$0xff]  ;;  %s559_s2 = smov [#allocation8]  }
  0x22   :  { %s359_s24 = sshll.u32 %s559_s2, 4  ;;  %s360_s24 = int_to_ptr.vmem [resolvable:$true] %s359_s24 }
  0x23   :  { %406 = vmatpush3.bf16.msra.mxu0 %v473_v2  ;;  %456 = vmatpush3.bf16.msra.mxu1 %v473_v2  ;;  %s527_s25 = scalar_lea.vmem %s360_s24, 1664  ;;  %p532_p11 = scmp.lt.s32.totalorder %s360_s24, %s360_s24 }
  0x24   :  { %407 = vmatprep.subr.bf16.mxu0 %v557_v0  ;;  %449 = vmatprep.subr.bf16.mxu1 %v557_v0  ;;  %p528_p10 = scmp.ne.s32.totalorder %s360_s24, %s527_s25  ;;  %p533_p12 = scmp.lt.s32.totalorder %s527_s25, %s527_s25 }
  0x26   :  { %p534_p13 = por %p533_p12, %p532_p11 }
  0x27   :  { %408 = vmatpush3.bf16.msra.mxu0 %v474_v3  ;;  %457 = vmatpush3.bf16.msra.mxu1 %v474_v3 }
  0x28   :  { %409 = vmatprep.subr.bf16.mxu0 %v557_v0  ;;  %450 = vmatprep.subr.bf16.mxu1 %v557_v0  ;;  %p535_p0 = pnand %p534_p13, %p528_p10 }
  0x2b   :  { %410 = vmatpush3.bf16.msra.mxu0 %v475_v4  ;;  %458 = vmatpush3.bf16.msra.mxu1 %v475_v4 }
  0x2c   :  { %411 = vmatprep.subr.bf16.mxu0 %v557_v0  ;;  %451 = vmatprep.subr.bf16.mxu1 %v557_v0 }
  0x2f   :  { %412 = vmatpush3.bf16.msra.mxu0 %v476_v5  ;;  %459 = vmatpush3.bf16.msra.mxu1 %v476_v5 }
  0x30   :  { %413 = vmatprep.subr.bf16.mxu0 %v557_v0  ;;  %452 = vmatprep.subr.bf16.mxu1 %v557_v0 }
  0x33   :  { %414 = vmatpush3.bf16.msra.mxu0 %v477_v6  ;;  %460 = vmatpush3.bf16.msra.mxu1 %v477_v6 }
  0x34   :  { %415 = vmatprep.subr.bf16.mxu0 %v557_v0  ;;  %453 = vmatprep.subr.bf16.mxu1 %v557_v0 }
  0x37   :  { %416 = vmatpush3.bf16.msra.mxu0 %v478_v7  ;;  %461 = vmatpush3.bf16.msra.mxu1 %v478_v7 }
  0x38   :  { %417 = vmatprep.subr.bf16.mxu0 %v557_v0  ;;  %454 = vmatprep.subr.bf16.mxu1 %v557_v0 }
  0x3b   :  { %418 = vmatpush3.bf16.msra.mxu0 %v479_v8  ;;  %462 = vmatpush3.bf16.msra.mxu1 %v479_v8 }
  0x3e   :  { %420 = vmatmul.mubr.bf16.vlgmr.msra.gmra.mxu0 %v480_v9  ;;  %436 = vmatmul.mubr.bf16.vlgmr.msra.gmra.mxu1 %v481_v10 }
  0x3f   :  { %423 = vmatprep.mubr.msk.bf16.mxu0 %vm558_vm0, %v557_v0  ;;  %439 = vmatprep.mubr.msk.bf16.mxu1 %vm558_vm0, %v557_v0 }
  0x46   :  { %424 = vmatmul.mubr.bf16.gmra.mxu0 %v482_v11  ;;  %440 = vmatmul.mubr.bf16.gmra.mxu1 %v483_v12 }
  0x47   :  { %427 = vmatprep.mubr.msk.bf16.mxu0 %vm558_vm0, %v557_v0  ;;  %443 = vmatprep.mubr.msk.bf16.mxu1 %vm558_vm0, %v557_v0 }
  0x4e   :  { %428 = vmatmul.mubr.bf16.gmra.mxu0 %v484_v13  ;;  %444 = vmatmul.mubr.bf16.gmra.mxu1 %v485_v14 }
  0x4f   :  { %431 = vmatprep.mubr.msk.bf16.mxu0 %vm558_vm0, %v557_v0 }
  0x56   :  { %432 = vmatmul.mubr.bf16.gmra.mxu0 %v486_v15 }
  0xfe   :  { %v225_v17 = vpop.f32.mrf.mxu0  ;;  %v257_v18 = vpop.f32.mrf.mxu1 }
  0xff   :  { %v328_v19 = vadd.f32 %v387_v16, %v225_v17  ;;  %v336_v20 = vadd.f32 %v387_v16, %v257_v18 }
 0x100   :  { %v421_v21 = vpop.f32.mrf.mxu0  ;;  %v437_v22 = vpop.f32.mrf.mxu1 }
 0x101   :  { %341 = vst [vmem:[#allocation8] sm:$0xff] %v328_v19  ;;  %349 = vst [vmem:[#allocation8 + $0x40] sm:$0xff] %v336_v20 }
 0x102   :  { %v228_v23 = vpop.f32.mrf.mxu0  ;;  %v260_v24 = vpop.f32.mrf.mxu1 }
 0x103   :  { %v329_v25 = vadd.f32 %v387_v16, %v228_v23  ;;  %v337_v26 = vadd.f32 %v387_v16, %v260_v24 }
 0x104   :  { %v422_v27 = vpop.f32.mrf.mxu0  ;;  %v438_v28 = vpop.f32.mrf.mxu1 }
 0x105   :  { %342 = vst [vmem:[#allocation8 + $0x8] sm:$0xff] %v329_v25  ;;  %350 = vst [vmem:[#allocation8 + $0x48] sm:$0xff] %v337_v26 }
 0x106   :  { %v233_v29 = vpop.f32.mrf.mxu0  ;;  %v265_v30 = vpop.f32.mrf.mxu1 }
 0x107   :  { %v330_v31 = vadd.f32 %v387_v16, %v233_v29  ;;  %v338_v32 = vadd.f32 %v387_v16, %v265_v30 }
 0x108   :  { %v425_v33 = vpop.f32.mrf.mxu0  ;;  %v441_v34 = vpop.f32.mrf.mxu1 }
 0x109   :  { %343 = vst [vmem:[#allocation8 + $0x10] sm:$0xff] %v330_v31  ;;  %351 = vst [vmem:[#allocation8 + $0x50] sm:$0xff] %v338_v32 }
 0x10a   :  { %v236_v35 = vpop.f32.mrf.mxu0  ;;  %v268_v36 = vpop.f32.mrf.mxu1 }
 0x10b   :  { %v331_v37 = vadd.f32 %v387_v16, %v236_v35  ;;  %v339_v38 = vadd.f32 %v387_v16, %v268_v36 }
 0x10c   :  { %v426_v39 = vpop.f32.mrf.mxu0  ;;  %v442_v40 = vpop.f32.mrf.mxu1 }
 0x10d   :  { %344 = vst [vmem:[#allocation8 + $0x18] sm:$0xff] %v331_v37  ;;  %352 = vst [vmem:[#allocation8 + $0x58] sm:$0xff] %v339_v38 }
 0x10e   :  { %v241_v41 = vpop.f32.mrf.mxu0  ;;  %v273_v42 = vpop.f32.mrf.mxu1 }
 0x10f   :  { %v332_v43 = vadd.f32 %v387_v16, %v241_v41  ;;  %v340_v44 = vadd.f32 %v387_v16, %v273_v42 }
 0x110   :  { %v429_v45 = vpop.f32.mrf.mxu0  ;;  %v445_v46 = vpop.f32.mrf.mxu1 }
 0x111   :  { %345 = vst [vmem:[#allocation8 + $0x20] sm:$0xff] %v332_v43  ;;  %353 = vst [vmem:[#allocation8 + $0x60] sm:$0xff] %v340_v44 }
 0x112   :  { %v244_v47 = vpop.f32.mrf.mxu0  ;;  %v276_v48 = vpop.f32.mrf.mxu1 }
 0x113   :  { %v333_v49 = vadd.f32 %v387_v16, %v244_v47 }
 0x114   :  { %v430_v50 = vpop.f32.mrf.mxu0  ;;  %v446_v51 = vpop.f32.mrf.mxu1 }
 0x115   :  { %346 = vst [vmem:[#allocation8 + $0x28] sm:$0xff] %v333_v49 }
 0x116   :  { %v249_v52 = vpop.f32.mrf.mxu0 }
 0x117   :  { %v334_v53 = vadd.f32 %v387_v16, %v249_v52 }
 0x118   :  { %v433_v54 = vpop.f32.mrf.mxu0 }
 0x119   :  { %347 = vst [vmem:[#allocation8 + $0x30] sm:$0xff] %v334_v53 }
 0x11a   :  { %v252_v55 = vpop.f32.mrf.mxu0 }
 0x11b   :  { %v335_v56 = vadd.f32 %v387_v16, %v252_v55 }
 0x11c   :  { %v434_v57 = vpop.f32.mrf.mxu0 }
 0x11d   :  { %348 = vst [vmem:[#allocation8 + $0x38] sm:$0xff] %v335_v56 }
 0x11e   :  { %538 = shalt.err (!%p535_p0)
}
 0x11f   :  { %s560_s26 = smov 128   ;;  %s561_s27 = smov 8  }
 0x120   :  { %365 = dma.vmem_to_hbm [thread:$0]  %s360_s24, 1664, %s604_s3, [#allocation5], %s560_s26, %s560_s26, %s561_s27  }
 0x121   :  { %551 = dma.done.wait [#allocation5], 1664  }
 0x122   :  { %552 = vsyncadd [#allocation5], 4294965632 }
 0x123   :  { %369 = vsyncpa [#allocation4], 1 }
 0x124   :  { %370 = vsyncpa [#allocation7], 1 }
 0x125   :  { %371 = vsyncpa [#allocation5], 1 }

</bundles_post_ra>
